<compile_context>
chip_gen: v6e
topology: v6e:2x2x1
jax: 0.10.0
libtpu: 0.0.40
codegen_flags: <defaults>
</compile_context>

<pallas_src>
import jax
import jax.numpy as jnp
from jax.experimental import pallas as pl
from jax.experimental.pallas import tpu as pltpu


def _round_up(x: int, m: int) -> int:
    return ((x + m - 1) // m) * m


# --------------------------- kernels --------------------------------------- #

def _suffix_linear_kernel_single_k(x_ref, w_ref, b_ref, o_ref):
    """Whole K reduction fits one tile: matmul + bias + sigmoid, no scratch."""
    z = jnp.dot(x_ref[...], w_ref[...], preferred_element_type=jnp.float32)
    z = z + b_ref[...]                      # (tm, tn) + (1, tn) broadcast
    o_ref[...] = jax.nn.sigmoid(z).astype(o_ref.dtype)


def _suffix_linear_kernel_multi_k(x_ref, w_ref, b_ref, o_ref, acc_ref):
    """One (tm, tn) output tile; K is the innermost reduction grid axis."""
    k = pl.program_id(2)

    @pl.when(k == 0)
    def _init():
        # Fold the bias into the accumulator init: no extra add in the epilogue.
        acc_ref[...] = jnp.broadcast_to(b_ref[...], acc_ref.shape)

    # MXU matmul, f32 accumulation regardless of operand dtype.
    acc_ref[...] += jnp.dot(
        x_ref[...], w_ref[...], preferred_element_type=jnp.float32
    )

    @pl.when(k == pl.num_programs(2) - 1)
    def _finalize():
        # f32 sigmoid (EUP exp + divide), once per output tile.
        o_ref[...] = jax.nn.sigmoid(acc_ref[...]).astype(o_ref.dtype)


# --------------------------- wrapper ---------------------------------------- #

def suffix_linear(x, weights, bias, *, use_bf16=False, tm=512, tn=256, tk=512):
    """sigmoid(x @ weights + bias) via a tiled, pipelined Pallas TPU kernel.

    x:       [..., K]   (leading dims folded into M)
    weights: [K, N]
    bias:    [N] or [1, N]
    use_bf16: cast MXU operands to bf16 (f32 accumulation) — fast path on v6e/v7x.
    """
    orig_shape = x.shape
    K = orig_shape[-1]
    x2d = x.reshape(-1, K)
    M = x2d.shape[0]
    K2, N = weights.shape
    assert K == K2, "feature dims must match"
    out_dtype = x.dtype

    # --- Tile sizes (hardware-friendly, clamped to the padded problem) -------
    tm = max(8, min(tm, _round_up(M, 8)))        # sublane multiple
    tn = max(128, min(tn, _round_up(N, 128)))    # lane multiple (lane-dense out)
    tk = max(128, min(tk, _round_up(K, 128)))    # lane multiple for x

    Mp = _round_up(M, tm)
    Kp = _round_up(K, tk)
    Np = _round_up(N, tn)

    # --- Zero-pad / cast only when actually needed ---------------------------
    compute_dtype = jnp.bfloat16 if use_bf16 else x2d.dtype
    xp = x2d
    if (Mp, Kp) != (M, K):
        xp = jnp.pad(xp, ((0, Mp - M), (0, Kp - K)))
    if xp.dtype != compute_dtype:
        xp = xp.astype(compute_dtype)

    wp = weights
    if (Kp, Np) != (K, N):
        wp = jnp.pad(wp, ((0, Kp - K), (0, Np - N)))
    if wp.dtype != compute_dtype:
        wp = wp.astype(compute_dtype)

    bp = bias.reshape(1, -1).astype(jnp.float32)
    if Np != N:
        bp = jnp.pad(bp, ((0, 0), (0, Np - N)))

    n_k = Kp // tk
    single_k = n_k == 1

    # --- VMEM budget: double-buffered tiles (+ f32 accumulator if multi-K) ---
    in_elem = jnp.dtype(compute_dtype).itemsize
    out_elem = jnp.dtype(out_dtype).itemsize
    vmem_need = (
        2 * (tm * tk * in_elem + tk * tn * in_elem + tn * 4)   # x, w, bias tiles
        + 2 * (tm * tn * out_elem)                             # output tiles
        + (0 if single_k else tm * tn * 4)                     # acc scratch
    )
    vmem_limit = min(max(2 * vmem_need, 8 * 1024 * 1024), 32 * 1024 * 1024)

    if single_k:
        out_padded = pl.pallas_call(
            _suffix_linear_kernel_single_k,
            out_shape=jax.ShapeDtypeStruct((Mp, Np), out_dtype),
            grid=(Mp // tm, Np // tn),
            in_specs=[
                pl.BlockSpec((tm, tk), lambda i, j: (i, 0)),
                pl.BlockSpec((tk, tn), lambda i, j: (0, j)),
                pl.BlockSpec((1, tn), lambda i, j: (0, j)),
            ],
            out_specs=pl.BlockSpec((tm, tn), lambda i, j: (i, j)),
            compiler_params=pltpu.CompilerParams(
                dimension_semantics=("parallel", "parallel"),
                vmem_limit_bytes=vmem_limit,
            ),
        )(xp, wp, bp)
    else:
        out_padded = pl.pallas_call(
            _suffix_linear_kernel_multi_k,
            out_shape=jax.ShapeDtypeStruct((Mp, Np), out_dtype),
            grid=(Mp // tm, Np // tn, n_k),
            in_specs=[
                pl.BlockSpec((tm, tk), lambda i, j, k: (i, k)),
                pl.BlockSpec((tk, tn), lambda i, j, k: (k, j)),
                pl.BlockSpec((1, tn), lambda i, j, k: (0, j)),
            ],
            out_specs=pl.BlockSpec((tm, tn), lambda i, j, k: (i, j)),
            scratch_shapes=[pltpu.VMEM((tm, tn), jnp.float32)],
            compiler_params=pltpu.CompilerParams(
                dimension_semantics=("parallel", "parallel", "arbitrary"),
                vmem_limit_bytes=vmem_limit,
            ),
        )(xp, wp, bp)

    out = out_padded[:M, :N]
    return out.reshape(orig_shape[:-1] + (N,))


# --------------------------- self-test --------------------------------------- #

if __name__ == "__main__":
    key = jax.random.PRNGKey(0)
    kx, kw, kb, kx2, kw2, kb2 = jax.random.split(key, 6)

    # ---- Small shapes consistent with the module: batch=8, in=32, out=16 ----
    M, K, N = 8, 32, 16
    x = jax.random.normal(kx, (M, K), dtype=jnp.float32)
    weights = jax.random.normal(kw, (K, N), dtype=jnp.float32) * 0.1
    bias = jax.random.normal(kb, (N,), dtype=jnp.float32) * 0.1
    ref = jax.nn.sigmoid(x @ weights + bias)

    # Exact-precision path (f32 MXU operands): tight tolerance.
    out_f32 = jax.block_until_ready(suffix_linear(x, weights, bias, use_bf16=False))
    assert out_f32.shape == (M, N)
    assert jnp.allclose(out_f32, ref, atol=1e-5, rtol=1e-5), "f32 path mismatch"

    # bf16-MXU path (the fast path on v6e/v7x): relaxed tolerance.
    out_bf16 = jax.block_until_ready(suffix_linear(x, weights, bias, use_bf16=True))
    assert jnp.allclose(out_bf16, ref, atol=2e-2, rtol=2e-2), "bf16 path mismatch"

    # ---- A multi-tile case exercising the K-reduction / grid pipelining -----
    M2, K2_, N2 = 256, 768, 256
    x2 = jax.random.normal(kx2, (M2, K2_), dtype=jnp.float32)
    w2 = jax.random.normal(kw2, (K2_, N2), dtype=jnp.float32) * 0.05
    b2 = jax.random.normal(kb2, (N2,), dtype=jnp.float32) * 0.05
    ref2 = jax.nn.sigmoid(x2 @ w2 + b2)

    out2 = jax.block_until_ready(
        suffix_linear(x2, w2, b2, use_bf16=False, tk=256)
    )
    assert out2.shape == (M2, N2)
    assert jnp.allclose(out2, ref2, atol=1e-4, rtol=1e-4), "tiled f32 path mismatch"

    out2_bf16 = jax.block_until_ready(
        suffix_linear(x2, w2, b2, use_bf16=True, tk=256)
    )
    assert jnp.allclose(out2_bf16, ref2, atol=3e-2, rtol=3e-2), "tiled bf16 path mismatch"

    # ---- 3-D input (leading dims folded into M) ------------------------------
    x3 = jax.random.normal(kx, (2, 4, K), dtype=jnp.float32)
    ref3 = jax.nn.sigmoid(x3 @ weights + bias)
    out3 = jax.block_until_ready(suffix_linear(x3, weights, bias))
    assert out3.shape == (2, 4, N)
    assert jnp.allclose(out3, ref3, atol=1e-5, rtol=1e-5), "3-D input mismatch"

    print("KERNEL_OK")
</pallas_src>

<mosaic_0001>
module attributes {stable_mosaic.version = 11 : i64} {
  func.func @_suffix_linear_kernel_single_k(%arg0: i32, %arg1: i32, %arg2: memref<8x128xf32, #tpu.memory_space<vmem>>, %arg3: memref<128x128xf32, #tpu.memory_space<vmem>>, %arg4: memref<1x128xf32, #tpu.memory_space<vmem>>, %arg5: memref<8x128xf32, #tpu.memory_space<vmem>>) attributes {dimension_semantics = [#tpu.dimension_semantics<parallel>, #tpu.dimension_semantics<parallel>], iteration_bounds = array<i64: 1, 1>, scalar_prefetch = 0 : i64, scratch_operands = 0 : i64, tpu.core_type = #tpu.core_type<tc>, window_params = [{transform_indices = @transform_0, window_bounds = array<i64: 8, 128>}, {transform_indices = @transform_1, window_bounds = array<i64: 128, 128>}, {transform_indices = @transform_2, window_bounds = array<i64: 1, 128>}, {transform_indices = @transform_3, window_bounds = array<i64: 8, 128>}]} {
    %c0 = arith.constant 0 : index
    %c0_0 = arith.constant 0 : index
    %0 = vector.load %arg2[%c0, %c0_0] : memref<8x128xf32, #tpu.memory_space<vmem>>, vector<8x128xf32>
    %c0_1 = arith.constant 0 : index
    %c0_2 = arith.constant 0 : index
    %1 = vector.load %arg3[%c0_1, %c0_2] : memref<128x128xf32, #tpu.memory_space<vmem>>, vector<128x128xf32>
    %cst = arith.constant dense<0.000000e+00> : vector<8x128xf32>
    %2 = tpu.matmul %0, %1, %cst {dimension_numbers = #tpu.dot_dimension_numbers<[1], [0], [0], [1], [0, 0, 1, 1], [], []>} : vector<8x128xf32>, vector<128x128xf32>, vector<8x128xf32> -> vector<8x128xf32>
    %c0_3 = arith.constant 0 : index
    %c0_4 = arith.constant 0 : index
    %3 = vector.load %arg4[%c0_3, %c0_4] : memref<1x128xf32, #tpu.memory_space<vmem>>, vector<1x128xf32>
    %4 = vector.broadcast %3 : vector<1x128xf32> to vector<8x128xf32>
    %5 = arith.addf %2, %4 : vector<8x128xf32>
    %6 = arith.negf %5 : vector<8x128xf32>
    %7 = math.exp %6 : vector<8x128xf32>
    %cst_5 = arith.constant 1.000000e+00 : f32
    %8 = vector.broadcast %cst_5 : f32 to vector<8x128xf32>
    %9 = arith.addf %8, %7 : vector<8x128xf32>
    %10 = arith.divf %8, %9 : vector<8x128xf32>
    %c0_6 = arith.constant 0 : index
    %c0_7 = arith.constant 0 : index
    %11 = vector.load %arg5[%c0_6, %c0_7] : memref<8x128xf32, #tpu.memory_space<vmem>>, vector<8x128xf32>
    tpu.vector_store %arg5[%c0_6, %c0_7], %10 {strides = array<i32>} : memref<8x128xf32, #tpu.memory_space<vmem>>, vector<8x128xf32>,
    return
  }
  func.func @transform_0(%arg0: i32, %arg1: i32) -> (i32, i32) {
    %c0_i32 = arith.constant 0 : i32
    %c0_i32_0 = arith.constant 0 : i32
    return %arg0, %c0_i32 : i32, i32
  }
  func.func @transform_1(%arg0: i32, %arg1: i32) -> (i32, i32) {
    %c0_i32 = arith.constant 0 : i32
    %c0_i32_0 = arith.constant 0 : i32
    return %c0_i32, %arg1 : i32, i32
  }
  func.func @transform_2(%arg0: i32, %arg1: i32) -> (i32, i32) {
    %c0_i32 = arith.constant 0 : i32
    %c0_i32_0 = arith.constant 0 : i32
    return %c0_i32, %arg1 : i32, i32
  }
  func.func @transform_3(%arg0: i32, %arg1: i32) -> (i32, i32) {
    %c0_i32 = arith.constant 0 : i32
    return %arg0, %arg1 : i32, i32
  }
}

</mosaic_0001>

<bundles_post_ra>
// kernel: tpu_custom_call.1
= control target key start
LH: loop header
LB: loop body
LE: loop exit
PB: predicated region body
PF: predicated region fallthrough
CT: control target
= control target key end

     0   :  { %8 = vsyncpa [#allocation3], 0  ;;  %s328_s0 = inlined_call_operand.hbm [shape: f32[8,128], index: 0, kind: input, shape index: {}]   ;;  %s329_s1 = inlined_call_operand.hbm [shape: f32[128,128], index: 1, kind: input, shape index: {}]   ;;  %s330_s2 = inlined_call_operand.vmem [shape: f32[1,128], index: 2, kind: input, shape index: {}]   ;;  %s331_s3 = inlined_call_operand.hbm [shape: f32[8,128], index: 3, kind: output, shape index: {}]  }
   0x1   :  { %9 = vsyncpa [#allocation6], 0 }
   0x2   :  { %10 = vsyncpa [#allocation4], 0  ;;  %s289_s12 = smov [#allocation2]   ;;  %s290_s14 = smov [#allocation5]  }
   0x3   :  { %s17_s13 = sshll.u32 %s289_s12, 4  ;;  %s26_s15 = sshll.u32 %s290_s14, 4  ;;  %s18_s13 = int_to_ptr.vmem [resolvable:$true] %s17_s13  ;;  %s27_s15 = int_to_ptr.vmem [resolvable:$true] %s26_s15 }
   0x4   :  { %s231_s16 = scalar_lea.vmem %s18_s13, 128  ;;  %p236_p1 = scmp.lt.s32.totalorder %s18_s13, %s18_s13 }
   0x5   :  { %p232_p0 = scmp.ne.s32.totalorder %s18_s13, %s231_s16  ;;  %p237_p2 = scmp.lt.s32.totalorder %s231_s16, %s231_s16 }
   0x7   :  { %p238_p3 = por %p237_p2, %p236_p1 }
   0x9   :  { %p239_p4 = pnand %p238_p3, %p232_p0 }
   0xb   :  { %242 = shalt.err (!%p239_p4)
}
   0xc   :  { %20 = dma.hbm_to_vmem [thread:$0]  %s328_s0, 128, %s18_s13, [#allocation3]  }
   0xd   :  { %s251_s19 = scalar_lea.vmem %s27_s15, 2048  ;;  %p256_p6 = scmp.lt.s32.totalorder %s27_s15, %s27_s15 }
   0xe   :  { %p252_p5 = scmp.ne.s32.totalorder %s27_s15, %s251_s19  ;;  %p257_p7 = scmp.lt.s32.totalorder %s251_s19, %s251_s19 }
  0x10   :  { %p258_p8 = por %p257_p7, %p256_p6 }
  0x12   :  { %p259_p9 = pnand %p258_p8, %p252_p5 }
  0x14   :  { %262 = shalt.err (!%p259_p9)
}
  0x15   :  { %s291_s20 = smov 128   ;;  %s292_s21 = smov 8  }
  0x16   :  { %32 = dma.hbm_to_vmem [thread:$0]  %s329_s1, 2048, %s27_s15, [#allocation6], %s291_s20, %s291_s20, %s292_s21  }
  0x17   :  { %283 = dma.done.wait [#allocation3], 128  }
  0x18   :  { %284 = vsyncadd [#allocation3], 4294967168 }
  0x19   :  { %285 = dma.done.wait [#allocation6], 2048  }
  0x1a   :  { %286 = vsyncadd [#allocation6], 4294965248  ;;  %v293_v0 = vmov 0.0   ;;  %vm294_vm0 = vmmov 0   ;;  %v57_v1 = vld [vmem:[#allocation5 + $0x78] sm:$0xff]  ;;  %v56_v2 = vld [vmem:[#allocation5 + $0x70] sm:$0xff] }
  0x1b   :  { %177 = vmatprep.subr.mxu0 %v293_v0  ;;  %209 = vmatprep.mubr.msk.f32.mxu0 %vm294_vm0, %v293_v0  ;;  %v55_v3 = vld [vmem:[#allocation5 + $0x68] sm:$0xff]  ;;  %v54_v4 = vld [vmem:[#allocation5 + $0x60] sm:$0xff]  ;;  %v53_v5 = vld [vmem:[#allocation5 + $0x58] sm:$0xff]  ;;  %s295_s24 = smov [#allocation7]  }
  0x1c   :  { %178 = vmatpush3.msra.mxu0 %v57_v1  ;;  %v52_v6 = vld [vmem:[#allocation5 + $0x50] sm:$0xff]  ;;  %v51_v7 = vld [vmem:[#allocation5 + $0x48] sm:$0xff]  ;;  %v50_v8 = vld [vmem:[#allocation5 + $0x40] sm:$0xff]  ;;  %s148_s25 = sshll.u32 %s295_s24, 4  ;;  %s149_s25 = int_to_ptr.vmem [resolvable:$true] %s148_s25 }
  0x1d   :  { %179 = vmatprep.subr.mxu0 %v293_v0  ;;  %v49_v9 = vld [vmem:[#allocation5 + $0x38] sm:$0xff]  ;;  %v48_v10 = vld [vmem:[#allocation5 + $0x30] sm:$0xff]  ;;  %v47_v11 = vld [vmem:[#allocation5 + $0x28] sm:$0xff]  ;;  %s263_s26 = scalar_lea.vmem %s149_s25, 128  ;;  %p268_p11 = scmp.lt.s32.totalorder %s149_s25, %s149_s25 }
  0x1e   :  { %180 = vmatpush3.msra.mxu0 %v56_v2  ;;  %v46_v12 = vld [vmem:[#allocation5 + $0x20] sm:$0xff]  ;;  %v45_v13 = vld [vmem:[#allocation5 + $0x18] sm:$0xff]  ;;  %v44_v14 = vld [vmem:[#allocation5 + $0x10] sm:$0xff]  ;;  %p264_p10 = scmp.ne.s32.totalorder %s149_s25, %s263_s26  ;;  %p269_p12 = scmp.lt.s32.totalorder %s263_s26, %s263_s26 }
  0x1f   :  { %181 = vmatprep.subr.mxu0 %v293_v0  ;;  %v43_v15 = vld [vmem:[#allocation5 + $0x8] sm:$0xff]  ;;  %v42_v16 = vld [vmem:[#allocation5] sm:$0xff]  ;;  %v41_v17 = vld [vmem:[#allocation2] sm:$0xff] }
  0x20   :  { %182 = vmatpush3.msra.mxu0 %v55_v3  ;;  %v158_v18 = vld [vmem:[%s330_s2] ss:$0 sm:$0xff]  ;;  %p270_p13 = por %p269_p12, %p268_p11 }
  0x21   :  { %183 = vmatprep.subr.mxu0 %v293_v0 }
  0x22   :  { %184 = vmatpush3.msra.mxu0 %v54_v4  ;;  %p271_p0 = pnand %p270_p13, %p264_p10 }
  0x23   :  { %185 = vmatprep.subr.mxu0 %v293_v0 }
  0x24   :  { %186 = vmatpush3.msra.mxu0 %v53_v5 }
  0x25   :  { %187 = vmatprep.subr.mxu0 %v293_v0 }
  0x26   :  { %188 = vmatpush3.msra.mxu0 %v52_v6 }
  0x27   :  { %189 = vmatprep.subr.mxu0 %v293_v0 }
  0x28   :  { %190 = vmatpush3.msra.mxu0 %v51_v7 }
  0x29   :  { %191 = vmatprep.subr.mxu0 %v293_v0 }
  0x2a   :  { %192 = vmatpush3.msra.mxu0 %v50_v8 }
  0x2b   :  { %193 = vmatprep.subr.mxu0 %v293_v0 }
  0x2c   :  { %194 = vmatpush3.msra.mxu0 %v49_v9 }
  0x2d   :  { %195 = vmatprep.subr.mxu0 %v293_v0 }
  0x2e   :  { %196 = vmatpush3.msra.mxu0 %v48_v10 }
  0x2f   :  { %197 = vmatprep.subr.mxu0 %v293_v0 }
  0x30   :  { %198 = vmatpush3.msra.mxu0 %v47_v11 }
  0x31   :  { %199 = vmatprep.subr.mxu0 %v293_v0 }
  0x32   :  { %200 = vmatpush3.msra.mxu0 %v46_v12 }
  0x33   :  { %201 = vmatprep.subr.mxu0 %v293_v0 }
  0x34   :  { %202 = vmatpush3.msra.mxu0 %v45_v13 }
  0x35   :  { %203 = vmatprep.subr.mxu0 %v293_v0 }
  0x36   :  { %204 = vmatpush3.msra.mxu0 %v44_v14 }
  0x37   :  { %205 = vmatprep.subr.mxu0 %v293_v0 }
  0x38   :  { %206 = vmatpush3.msra.mxu0 %v43_v15 }
  0x39   :  { %207 = vmatprep.subr.mxu0 %v293_v0 }
  0x3a   :  { %208 = vmatpush3.msra.mxu0 %v42_v16 }
  0x3b   :  { %210 = vmatmul.mubr.f32.vlgmr.msra.gmra.mxu0 %v41_v17 }
  0xfb   :  { %v131_v19 = vpop.f32.mrf.mxu0 }
  0xfc   :  { %v132_v20 = vadd.f32 %v158_v18, %v131_v19 }
  0xfd   :  { %v211_v21 = vpop.f32.mrf.mxu0 }
  0xfe   :  { %v159_v22 = vmul.f32 -1.442695, %v132_v20 }
 0x100   :  { %219 = vpow2.f32 %v159_v22 }
 0x10d   :  { %v220_v23 = vpop.eup %219 }
 0x10e   :  { %v138_v24 = vadd.f32 1.0, %v220_v23 }
 0x110   :  { %221 = vrcp.f32 %v138_v24 }
 0x11d   :  { %v222_v25 = vpop.eup %221 }
 0x11e   :  { %141 = vst [vmem:[#allocation7] sm:$0xff] %v222_v25 }
 0x11f   :  { %274 = shalt.err (!%p271_p0)
}
 0x120   :  { %151 = dma.vmem_to_hbm [thread:$0]  %s149_s25, 128, %s331_s3, [#allocation4]  }
 0x121   :  { %287 = dma.done.wait [#allocation4], 128  }
 0x122   :  { %288 = vsyncadd [#allocation4], 4294967168 }
 0x123   :  { %155 = vsyncpa [#allocation3], 1 }
 0x124   :  { %156 = vsyncpa [#allocation6], 1 }
 0x125   :  { %157 = vsyncpa [#allocation4], 1 }

</bundles_post_ra>
